<compile_context>
chip_gen: v5e
topology: v5e:2x2
jax: 0.10.0
libtpu: 0.0.40
codegen_flags: <defaults>
</compile_context>

<pallas_src>
import jax
import jax.numpy as jnp
from jax.experimental import pallas as pl
from jax.experimental.pallas import tpu as pltpu


def _round_up(x, m):
    return ((x + m - 1) // m) * m


def _vmem_capacity_bytes():
    """Physical per-core VMEM, conservatively defaulting to v7x (64 MiB)."""
    try:
        info = pltpu.get_tpu_info()
        cap = getattr(info, "vmem_capacity_bytes", None)
        if cap:
            return int(cap)
    except Exception:
        pass
    return 64 * 1024 * 1024


def sae_kernel(x_ref, bdec_ref, w_ref, benc_ref, o_ref):
    """One (tm, tn) output tile: out = (x - b_dec) @ W + b_enc.

    x_ref    : (tm, d_in)  input dtype (f32 or bf16)
    bdec_ref : (1, d_in)   f32
    w_ref    : (d_in, tn)  compute dtype (bf16 by default)
    benc_ref : (1, tn)     f32
    o_ref    : (tm, tn)    output dtype
    """
    # Centering in f32 (VPU, hidden under the MXU), then a single cast to the
    # matmul compute dtype.  f32 accumulation via preferred_element_type.
    xc = (x_ref[...].astype(jnp.float32) - bdec_ref[...]).astype(w_ref.dtype)
    acc = jnp.dot(xc, w_ref[...], preferred_element_type=jnp.float32)
    o_ref[...] = (acc + benc_ref[...]).astype(o_ref.dtype)


def prepare_sae_params(W_enc, b_dec, b_enc, *, compute_dtype=jnp.bfloat16):
    """One-time parameter prep.  Do NOT call per forward pass: the W_enc cast
    is a full HBM pass over the weight and must be amortized across calls."""
    w_c = jnp.asarray(W_enc).astype(compute_dtype)
    b_dec_r = jnp.asarray(b_dec).astype(jnp.float32).reshape(1, -1)
    b_enc_r = jnp.asarray(b_enc).astype(jnp.float32).reshape(1, -1)
    return w_c, b_dec_r, b_enc_r


def sae_forward(x, w_c, b_dec_r, b_enc_r, *, out_dtype=None, tm=None, tn=None):
    """out = (x - b_dec) @ W_enc + b_enc  (same semantics as the nn.Module).

    `w_c`, `b_dec_r`, `b_enc_r` come from prepare_sae_params().
    `out_dtype=jnp.bfloat16` halves output writeback bytes (useful on v5e).
    """
    B, d_in = x.shape
    d_in_w, d_sae = w_c.shape
    assert d_in == d_in_w
    assert b_dec_r.shape == (1, d_in) and b_enc_r.shape == (1, d_sae)

    out_dtype = x.dtype if out_dtype is None else out_dtype
    xbytes = jnp.dtype(x.dtype).itemsize
    cbytes = jnp.dtype(w_c.dtype).itemsize
    obytes = jnp.dtype(out_dtype).itemsize

    # ---- generation-aware VMEM budget --------------------------------------
    cap = _vmem_capacity_bytes()
    if cap >= 128 * 1024 * 1024:          # v5e / v6e
        vmem_budget = 96 * 1024 * 1024
        tn_cap = 2048
    else:                                  # v7x (64 MiB per TensorCore)
        vmem_budget = 40 * 1024 * 1024
        tn_cap = 1024

    def vmem_need(tm_, tn_, w_bufs_):
        return (2 * tm_ * d_in * xbytes            # x tiles (double-buffered)
                + tm_ * d_in * 4                   # (x - b_dec) f32 temporary
                + w_bufs_ * d_in * tn_ * cbytes    # W_enc tiles (Buffered(n))
                + 2 * d_in * 4                     # b_dec tiles
                + 2 * tn_ * 4                      # b_enc tiles
                + 2 * tm_ * tn_ * obytes           # output tiles
                + 2 * tm_ * tn_ * 4                # f32 matmul intermediate
                + 2 * 1024 * 1024)                 # Mosaic internal scratch

    # ---- tile selection -----------------------------------------------------
    # K is NOT split: tk = d_in (typical SAE d_in 768..4096 fits VMEM).
    # TODO(synk): add a K-split (accumulator) path for very large d_in.
    if tm is None:
        if B >= 256:
            tm = 256                       # MXU-friendly (v6e/v7x 256x256)
        elif B > 8:
            tm = _round_up(B, 16)          # full bf16 sublane packing
        else:
            tm = _round_up(B, 8)
    if tn is None:
        tn = min(tn_cap, _round_up(d_sae, 128))

    n_j = pl.cdiv(d_sae, tn)
    w_buffers = 3 if n_j >= 3 else 2       # deeper W buffering only when useful

    while tn > 128 and vmem_need(tm, tn, w_buffers) > vmem_budget:
        tn //= 2
        n_j = pl.cdiv(d_sae, tn)
        w_buffers = 3 if n_j >= 3 else 2
    while tm > 8 and vmem_need(tm, tn, w_buffers) > vmem_budget:
        tm = max(8, tm // 2)

    need = vmem_need(tm, tn, w_buffers)
    assert need <= vmem_budget, (
        f"tile plan needs {need} bytes of VMEM (budget {vmem_budget}); "
        f"shrink tn/tm")
    vmem_limit = int(min(vmem_budget, max(need + (4 << 20), 32 << 20)))

    n_i = pl.cdiv(B, tm)
    # j (d_sae blocks) outermost, i (batch blocks) inner: each W_enc slab is
    # DMA'd from HBM exactly once and reused across every batch tile.
    grid = (n_j, n_i)

    cost = pl.CostEstimate(
        flops=2 * B * d_in * d_sae,
        transcendentals=0,
        bytes_accessed=(n_j * B * d_in * xbytes      # x re-read per d_sae block
                        + d_in * d_sae * cbytes      # W_enc once
                        + d_in * 4 + d_sae * 4       # biases
                        + B * d_sae * obytes),       # output
    )

    return pl.pallas_call(
        sae_kernel,
        out_shape=jax.ShapeDtypeStruct((B, d_sae), out_dtype),
        grid_spec=pltpu.PrefetchScalarGridSpec(
            num_scalar_prefetch=0,
            grid=grid,
            in_specs=[
                pl.BlockSpec((tm, d_in), lambda j, i: (i, 0)),   # x
                pl.BlockSpec((1, d_in),  lambda j, i: (0, 0)),   # b_dec
                pl.BlockSpec((d_in, tn), lambda j, i: (0, j),    # W_enc
                             pipeline_mode=pl.Buffered(w_buffers)),
                pl.BlockSpec((1, tn),    lambda j, i: (0, j)),   # b_enc
            ],
            out_specs=pl.BlockSpec((tm, tn), lambda j, i: (i, j)),
        ),
        compiler_params=pltpu.CompilerParams(
            # d_sae axis parallel (megacore split keeps W traffic at 1x),
            # batch axis sequential.
            dimension_semantics=("parallel", "arbitrary"),
            vmem_limit_bytes=vmem_limit,
        ),
        cost_estimate=cost,
    )(x, b_dec_r, w_c, b_enc_r)


if __name__ == "__main__":
    # Small shapes consistent with the module (d_in = residual dim, d_sae = SAE dim).
    B, d_in, d_sae = 8, 256, 512

    key = jax.random.PRNGKey(0)
    k_x, k_w, k_bd, k_be = jax.random.split(key, 4)

    x = jax.random.normal(k_x, (B, d_in), dtype=jnp.float32)
    # The module normally loads a checkpoint; here parameters are synthetic.
    W_enc = jax.random.normal(k_w, (d_in, d_sae), dtype=jnp.float32) * 0.02
    b_dec = jax.random.normal(k_bd, (d_in,), dtype=jnp.float32) * 0.1
    b_enc = jax.random.normal(k_be, (d_sae,), dtype=jnp.float32) * 0.1

    ref = (x - b_dec[None, :]) @ W_enc + b_enc[None, :]

    # Default (fast) path: bf16 W_enc on the MXU, f32 accumulation.
    # prepare_sae_params is called ONCE (parameters are static across calls).
    w_bf16, b_dec_r, b_enc_r = prepare_sae_params(W_enc, b_dec, b_enc)
    out = sae_forward(x, w_bf16, b_dec_r, b_enc_r)
    out = jax.block_until_ready(out)
    assert out.shape == (B, d_sae)
    assert jnp.allclose(out, ref, atol=2e-2, rtol=2e-2), "bf16 path mismatch"

    # Full-precision path for a tight numerical check.
    w_f32, b_dec_r32, b_enc_r32 = prepare_sae_params(
        W_enc, b_dec, b_enc, compute_dtype=jnp.float32)
    out_f32 = sae_forward(x, w_f32, b_dec_r32, b_enc_r32)
    out_f32 = jax.block_until_ready(out_f32)
    assert jnp.allclose(out_f32, ref, atol=1e-4, rtol=1e-4), "f32 path mismatch"

    print("KERNEL_OK")
</pallas_src>

<mosaic_0001>
module attributes {stable_mosaic.version = 11 : i64} {
  func.func @sae_kernel(%arg0: i32, %arg1: i32, %arg2: memref<8x256xf32, #tpu.memory_space<vmem>>, %arg3: memref<1x256xf32, #tpu.memory_space<vmem>>, %arg4: memref<256x512xbf16, #tpu.memory_space<vmem>>, %arg5: memref<1x512xf32, #tpu.memory_space<vmem>>, %arg6: memref<8x512xf32, #tpu.memory_space<vmem>>) attributes {dimension_semantics = [#tpu.dimension_semantics<parallel>, #tpu.dimension_semantics<arbitrary>], iteration_bounds = array<i64: 1, 1>, scalar_prefetch = 0 : i64, scratch_operands = 0 : i64, tpu.core_type = #tpu.core_type<tc>, window_params = [{transform_indices = @transform_0, window_bounds = array<i64: 8, 256>}, {pipeline_mode = #tpu.pipeline_mode<synchronous>, transform_indices = @transform_1, window_bounds = array<i64: 1, 256>}, {pipeline_mode = #tpu.pipeline_mode<double_buffered>, transform_indices = @transform_2, window_bounds = array<i64: 256, 512>}, {transform_indices = @transform_3, window_bounds = array<i64: 1, 512>}, {transform_indices = @transform_4, window_bounds = array<i64: 8, 512>}]} {
    %c0 = arith.constant 0 : index
    %c0_0 = arith.constant 0 : index
    %0 = vector.load %arg2[%c0, %c0_0] : memref<8x256xf32, #tpu.memory_space<vmem>>, vector<8x256xf32>
    %c0_1 = arith.constant 0 : index
    %c0_2 = arith.constant 0 : index
    %1 = vector.load %arg3[%c0_1, %c0_2] : memref<1x256xf32, #tpu.memory_space<vmem>>, vector<1x256xf32>
    %2 = vector.broadcast %1 : vector<1x256xf32> to vector<8x256xf32>
    %3 = arith.subf %0, %2 : vector<8x256xf32>
    %4 = arith.truncf %3 : vector<8x256xf32> to vector<8x256xbf16>
    %c0_3 = arith.constant 0 : index
    %c0_4 = arith.constant 0 : index
    %5 = vector.load %arg4[%c0_3, %c0_4] : memref<256x512xbf16, #tpu.memory_space<vmem>>, vector<256x512xbf16>
    %cst = arith.constant dense<0.000000e+00> : vector<8x512xf32>
    %6 = tpu.matmul %4, %5, %cst {dimension_numbers = #tpu.dot_dimension_numbers<[1], [0], [0], [1], [0, 0, 1, 1], [], []>} : vector<8x256xbf16>, vector<256x512xbf16>, vector<8x512xf32> -> vector<8x512xf32>
    %c0_5 = arith.constant 0 : index
    %c0_6 = arith.constant 0 : index
    %7 = vector.load %arg5[%c0_5, %c0_6] : memref<1x512xf32, #tpu.memory_space<vmem>>, vector<1x512xf32>
    %8 = vector.broadcast %7 : vector<1x512xf32> to vector<8x512xf32>
    %9 = arith.addf %6, %8 : vector<8x512xf32>
    %c0_7 = arith.constant 0 : index
    %c0_8 = arith.constant 0 : index
    %10 = vector.load %arg6[%c0_7, %c0_8] : memref<8x512xf32, #tpu.memory_space<vmem>>, vector<8x512xf32>
    tpu.vector_store %arg6[%c0_7, %c0_8], %9 {strides = array<i32>} : memref<8x512xf32, #tpu.memory_space<vmem>>, vector<8x512xf32>,
    return
  }
  func.func @transform_0(%arg0: i32, %arg1: i32) -> (i32, i32) {
    %c0_i32 = arith.constant 0 : i32
    %c0_i32_0 = arith.constant 0 : i32
    return %arg1, %c0_i32 : i32, i32
  }
  func.func @transform_1(%arg0: i32, %arg1: i32) -> (i32, i32) {
    %c0_i32 = arith.constant 0 : i32
    %c0_i32_0 = arith.constant 0 : i32
    %c0_i32_1 = arith.constant 0 : i32
    return %c0_i32, %c0_i32_0 : i32, i32
  }
  func.func @transform_2(%arg0: i32, %arg1: i32) -> (i32, i32) {
    %c0_i32 = arith.constant 0 : i32
    %c0_i32_0 = arith.constant 0 : i32
    return %c0_i32, %arg0 : i32, i32
  }
  func.func @transform_3(%arg0: i32, %arg1: i32) -> (i32, i32) {
    %c0_i32 = arith.constant 0 : i32
    %c0_i32_0 = arith.constant 0 : i32
    return %c0_i32, %arg0 : i32, i32
  }
  func.func @transform_4(%arg0: i32, %arg1: i32) -> (i32, i32) {
    %c0_i32 = arith.constant 0 : i32
    return %arg1, %arg0 : i32, i32
  }
}

</mosaic_0001>

<bundles_post_ra>
// kernel: tpu_custom_call.1
= control target key start
LH: loop header
LB: loop body
LE: loop exit
PB: predicated region body
PF: predicated region fallthrough
CT: control target
= control target key end

     0   :  { %9 = vsyncpa [#allocation3], 0  ;;  %s1122_s0 = inlined_call_operand.hbm [shape: f32[8,256], index: 0, kind: input, shape index: {}]   ;;  %s1123_s1 = inlined_call_operand.hbm [shape: f32[1,256], index: 1, kind: input, shape index: {}]   ;;  %s1124_s2 = inlined_call_operand.hbm [shape: bf16[256,512], index: 2, kind: input, shape index: {}]   ;;  %s1125_s3 = inlined_call_operand.hbm [shape: f32[1,512], index: 3, kind: input, shape index: {}]   ;;  %s1126_s4 = inlined_call_operand.hbm [shape: f32[8,512], index: 4, kind: output, shape index: {}]  }
   0x1   :  { %10 = vsyncpa [#allocation6], 0 }
   0x2   :  { %11 = vsyncpa [#allocation9], 0  ;;  %s29_s17 = sshll.u32 %s1123_s1, 4  ;;  %s30_s17 = int_to_ptr.hbm [resolvable:$true] %s29_s17 }
   0x3   :  { %12 = vsyncpa [#allocation4], 0  ;;  %s1063_s18 = smov [#allocation5]   ;;  %s18_s22 = sshll.u32 %s1122_s0, 4  ;;  %s19_s22 = int_to_ptr.hbm [resolvable:$true] %s18_s22 }
   0x4   :  { %s31_s19 = sshll.u32 %s1063_s18, 4  ;;  %s1064_s23 = smov [#allocation2]   ;;  %s32_s19 = int_to_ptr.vmem [resolvable:$true] %s31_s19 }
   0x5   :  { %34 = dma.hbm_to_vmem [thread:$0]  %s30_s17, 32, %s32_s19, [#allocation6]  }
   0x6   :  { %s20_s24 = sshll.u32 %s1064_s23, 4  ;;  %s39_s27 = sshll.u32 %s1124_s2, 4  ;;  %s21_s24 = int_to_ptr.vmem [resolvable:$true] %s20_s24  ;;  %s40_s27 = int_to_ptr.hbm [resolvable:$true] %s39_s27 }
   0x7   :  { %23 = dma.hbm_to_vmem [thread:$0]  %s19_s22, 256, %s21_s24, [#allocation3]  }
   0x8   :  { %s1065_s1 = smov [#allocation7]   ;;  %s53_s5 = sshll.u32 %s1125_s3, 4  ;;  %s54_s5 = int_to_ptr.hbm [resolvable:$true] %s53_s5 }
   0x9   :  { %s41_s28 = sshll.u32 %s1065_s1, 4  ;;  %s1066_s6 = smov 256   ;;  %s42_s28 = int_to_ptr.vmem [resolvable:$true] %s41_s28 }
   0xa   :  { %s1067_s0 = smov 16   ;;  %s1068_s7 = smov [#allocation8]  }
   0xb   :  { %47 = dma.hbm_to_vmem [thread:$0]  %s40_s27, 8192, %s42_s28, [#allocation6], %s1066_s6, %s1066_s6, %s1067_s0  }
   0xc   :  { %s55_s8 = sshll.u32 %s1068_s7, 4  ;;  %s56_s8 = int_to_ptr.vmem [resolvable:$true] %s55_s8 }
   0xd   :  { %58 = dma.hbm_to_vmem [thread:$0]  %s54_s5, 64, %s56_s8, [#allocation9]  }
   0xe   :  { %1055 = dma.done.wait [#allocation3], 256  }
   0xf   :  { %1056 = vsyncadd [#allocation3], 4294967040 }
  0x10   :  { %1057 = dma.done.wait [#allocation6], 8224  }
  0x11   :  { %1058 = vsyncadd [#allocation6], 4294959072 }
  0x12   :  { %1059 = dma.done.wait [#allocation9], 64  }
  0x13   :  { %1060 = vsyncadd [#allocation9], 4294967232  ;;  %v722_v0 = vld [vmem:[#allocation7 + $0xe0] sm:$0xf]  ;;  %v894_v1 = vld [vmem:[#allocation7 + $0xec] sm:$0xf0] }
  0x14   :  { %v850_v2 = vld [vmem:[#allocation7 + $0x1e0] sm:$0xf]  ;;  %v723_v3 = vor.u32 %v894_v1, %v722_v0  ;;  %v926_v4 = vld [vmem:[#allocation7 + $0x1ec] sm:$0xf0]  ;;  %v892_v5 = vld [vmem:[#allocation7 + $0xe4] sm:$0xf] }
  0x15   :  { %v724_v6 = vld [vmem:[#allocation7 + $0xf0] sm:$0xf0]  ;;  %v851_v7 = vor.u32 %v926_v4, %v850_v2  ;;  %v924_v9 = vld [vmem:[#allocation7 + $0x1e4] sm:$0xf]  ;;  %v706_v11 = vld [vmem:[#allocation7 + $0xc0] sm:$0xf] }
  0x16   :  { %v727_v8 = vor.u32 %v892_v5, %v724_v6  ;;  %v852_v10 = vld [vmem:[#allocation7 + $0x1f0] sm:$0xf0]  ;;  %481 = vmatpush.bf16.msra.mxu0 %v723_v3  ;;  %v890_v13 = vld [vmem:[#allocation7 + $0xcc] sm:$0xf0]  ;;  %v834_v14 = vld [vmem:[#allocation7 + $0x1c0] sm:$0xf] }
  0x17   :  { %v855_v12 = vor.u32 %v924_v9, %v852_v10  ;;  %v922_v15 = vld [vmem:[#allocation7 + $0x1cc] sm:$0xf0]  ;;  %494 = vmatpush.bf16.msra.mxu1 %v851_v7  ;;  %v707_v16 = vor.u32 %v890_v13, %v706_v11  ;;  %v888_v18 = vld [vmem:[#allocation7 + $0xc4] sm:$0xf]  ;;  %v708_v19 = vld [vmem:[#allocation7 + $0xd0] sm:$0xf0] }
  0x18   :  { %507 = vmatpush.bf16.msra.mxu2 %v727_v8  ;;  %v835_v17 = vor.u32 %v922_v15, %v834_v14  ;;  %v920_v20 = vld [vmem:[#allocation7 + $0x1c4] sm:$0xf]  ;;  %v711_v21 = vor.u32 %v888_v18, %v708_v19  ;;  %v836_v22 = vld [vmem:[#allocation7 + $0x1d0] sm:$0xf0]  ;;  %v690_v23 = vld [vmem:[#allocation7 + $0xa0] sm:$0xf] }
  0x19   :  { %520 = vmatpush.bf16.msra.mxu3 %v855_v12  ;;  %v886_v24 = vld [vmem:[#allocation7 + $0xac] sm:$0xf0]  ;;  %v839_v25 = vor.u32 %v920_v20, %v836_v22  ;;  %v818_v26 = vld [vmem:[#allocation7 + $0x1a0] sm:$0xf]  ;;  %v884_v28 = vld [vmem:[#allocation7 + $0xa4] sm:$0xf] }
  0x1a   :  { %v918_v27 = vld [vmem:[#allocation7 + $0x1ac] sm:$0xf0]  ;;  %482 = vmatpush.bf16.msra.mxu0 %v707_v16  ;;  %v691_v29 = vor.u32 %v886_v24, %v690_v23  ;;  %v692_v30 = vld [vmem:[#allocation7 + $0xb0] sm:$0xf0]  ;;  %v916_v31 = vld [vmem:[#allocation7 + $0x1a4] sm:$0xf] }
  0x1b   :  { %v820_v32 = vld [vmem:[#allocation7 + $0x1b0] sm:$0xf0]  ;;  %495 = vmatpush.bf16.msra.mxu1 %v835_v17  ;;  %v819_v33 = vor.u32 %v918_v27, %v818_v26  ;;  %v695_v34 = vor.u32 %v884_v28, %v692_v30  ;;  %v674_v35 = vld [vmem:[#allocation7 + $0x80] sm:$0xf]  ;;  %v882_v36 = vld [vmem:[#allocation7 + $0x8c] sm:$0xf0] }
  0x1c   :  { %508 = vmatpush.bf16.msra.mxu2 %v711_v21  ;;  %v802_v37 = vld [vmem:[#allocation7 + $0x180] sm:$0xf]  ;;  %v823_v38 = vor.u32 %v916_v31, %v820_v32  ;;  %v914_v39 = vld [vmem:[#allocation7 + $0x18c] sm:$0xf0]  ;;  %v880_v40 = vld [vmem:[#allocation7 + $0x84] sm:$0xf]  ;;  %v675_v44 = vor.u32 %v882_v36, %v674_v35 }
  0x1d   :  { %521 = vmatpush.bf16.msra.mxu3 %v839_v25  ;;  %v676_v41 = vld [vmem:[#allocation7 + $0x90] sm:$0xf0]  ;;  %v912_v42 = vld [vmem:[#allocation7 + $0x184] sm:$0xf]  ;;  %v803_v45 = vor.u32 %v914_v39, %v802_v37  ;;  %v658_v47 = vld [vmem:[#allocation7 + $0x60] sm:$0xf] }
  0x1e   :  { %v804_v43 = vld [vmem:[#allocation7 + $0x190] sm:$0xf0]  ;;  %483 = vmatpush.bf16.msra.mxu0 %v691_v29  ;;  %v679_v46 = vor.u32 %v880_v40, %v676_v41  ;;  %v878_v48 = vld [vmem:[#allocation7 + $0x6c] sm:$0xf0]  ;;  %v786_v49 = vld [vmem:[#allocation7 + $0x160] sm:$0xf] }
  0x1f   :  { %496 = vmatpush.bf16.msra.mxu1 %v819_v33  ;;  %v807_v50 = vor.u32 %v912_v42, %v804_v43  ;;  %v910_v51 = vld [vmem:[#allocation7 + $0x16c] sm:$0xf0]  ;;  %v876_v52 = vld [vmem:[#allocation7 + $0x64] sm:$0xf]  ;;  %v660_v53 = vld [vmem:[#allocation7 + $0x70] sm:$0xf0]  ;;  %v659_v56 = vor.u32 %v878_v48, %v658_v47 }
  0x20   :  { %509 = vmatpush.bf16.msra.mxu2 %v695_v34  ;;  %v908_v54 = vld [vmem:[#allocation7 + $0x164] sm:$0xf]  ;;  %v788_v55 = vld [vmem:[#allocation7 + $0x170] sm:$0xf0]  ;;  %v787_v57 = vor.u32 %v910_v51, %v786_v49  ;;  %v663_v58 = vor.u32 %v876_v52, %v660_v53  ;;  %v642_v59 = vld [vmem:[#allocation7 + $0x40] sm:$0xf] }
  0x21   :  { %522 = vmatpush.bf16.msra.mxu3 %v823_v38  ;;  %v874_v60 = vld [vmem:[#allocation7 + $0x4c] sm:$0xf0]  ;;  %v770_v61 = vld [vmem:[#allocation7 + $0x140] sm:$0xf]  ;;  %v791_v62 = vor.u32 %v908_v54, %v788_v55  ;;  %v872_v0 = vld [vmem:[#allocation7 + $0x44] sm:$0xf] }
  0x22   :  { %484 = vmatpush.bf16.msra.mxu0 %v675_v44  ;;  %v906_v63 = vld [vmem:[#allocation7 + $0x14c] sm:$0xf0]  ;;  %v644_v1 = vld [vmem:[#allocation7 + $0x50] sm:$0xf0]  ;;  %v904_v2 = vld [vmem:[#allocation7 + $0x144] sm:$0xf]  ;;  %v643_v4 = vor.u32 %v874_v60, %v642_v59 }
  0x23   :  { %497 = vmatpush.bf16.msra.mxu1 %v803_v45  ;;  %v772_v3 = vld [vmem:[#allocation7 + $0x150] sm:$0xf0]  ;;  %v626_v5 = vld [vmem:[#allocation7 + $0x20] sm:$0xf]  ;;  %v771_v6 = vor.u32 %v906_v63, %v770_v61  ;;  %v647_v7 = vor.u32 %v872_v0, %v644_v1  ;;  %v870_v8 = vld [vmem:[#allocation7 + $0x2c] sm:$0xf0] }
  0x24   :  { %510 = vmatpush.bf16.msra.mxu2 %v679_v46  ;;  %v754_v9 = vld [vmem:[#allocation7 + $0x120] sm:$0xf]  ;;  %v902_v10 = vld [vmem:[#allocation7 + $0x12c] sm:$0xf0]  ;;  %v775_v11 = vor.u32 %v904_v2, %v772_v3  ;;  %v868_v12 = vld [vmem:[#allocation7 + $0x24] sm:$0xf]  ;;  %v627_v18 = vor.u32 %v870_v8, %v626_v5 }
  0x25   :  { %523 = vmatpush.bf16.msra.mxu3 %v807_v50  ;;  %v628_v13 = vld [vmem:[#allocation7 + $0x30] sm:$0xf0]  ;;  %v900_v14 = vld [vmem:[#allocation7 + $0x124] sm:$0xf]  ;;  %v610_v16 = vld [vmem:[#allocation7] sm:$0xf]  ;;  %v755_v22 = vor.u32 %v902_v10, %v754_v9 }
  0x26   :  { %485 = vmatpush.bf16.msra.mxu0 %v659_v56  ;;  %v756_v15 = vld [vmem:[#allocation7 + $0x130] sm:$0xf0]  ;;  %v866_v17 = vld [vmem:[#allocation7 + $0xc] sm:$0xf0]  ;;  %v738_v19 = vld [vmem:[#allocation7 + $0x100] sm:$0xf]  ;;  %v631_v23 = vor.u32 %v868_v12, %v628_v13 }
  0x27   :  { %498 = vmatpush.bf16.msra.mxu1 %v787_v57  ;;  %v898_v20 = vld [vmem:[#allocation7 + $0x10c] sm:$0xf0]  ;;  %v864_v21 = vld [vmem:[#allocation7 + $0x4] sm:$0xf]  ;;  %v612_v24 = vld [vmem:[#allocation7 + $0x10] sm:$0xf0]  ;;  %v759_v27 = vor.u32 %v900_v14, %v756_v15  ;;  %v611_v34 = vor.u32 %v866_v17, %v610_v16 }
  0x28   :  { %511 = vmatpush.bf16.msra.mxu2 %v663_v58  ;;  %v896_v25 = vld [vmem:[#allocation7 + $0x104] sm:$0xf]  ;;  %v740_v26 = vld [vmem:[#allocation7 + $0x110] sm:$0xf0]  ;;  %v730_v28 = vld [vmem:[#allocation7 + $0xe8] sm:$0xf]  ;;  %v739_v38 = vor.u32 %v898_v20, %v738_v19  ;;  %v615_v39 = vor.u32 %v864_v21, %v612_v24 }
  0x29   :  { %524 = vmatpush.bf16.msra.mxu3 %v791_v62  ;;  %v895_v29 = vld [vmem:[#allocation7 + $0xf4] sm:$0xf0]  ;;  %v858_v30 = vld [vmem:[#allocation7 + $0x1e8] sm:$0xf]  ;;  %v893_v32 = vld [vmem:[#allocation7 + $0xec] sm:$0xf]  ;;  %v743_v44 = vor.u32 %v896_v25, %v740_v26 }
  0x2a   :  { %486 = vmatpush.bf16.msra.mxu0 %v643_v4  ;;  %v927_v31 = vld [vmem:[#allocation7 + $0x1f4] sm:$0xf0]  ;;  %v732_v33 = vld [vmem:[#allocation7 + $0xf8] sm:$0xf0]  ;;  %v75_v35 = vld [vmem:[#allocation2] sm:$0xff]  ;;  %v731_v45 = vor.u32 %v895_v29, %v730_v28  ;;  %s1069_s2 = smov [#allocation10]  }
  0x2b   :  { %499 = vmatpush.bf16.msra.mxu1 %v771_v6  ;;  %v77_v36 = vld [vmem:[#allocation5] sm:$0x3]  ;;  %v76_v37 = vld [vmem:[#allocation2 + $0x8] sm:$0xff]  ;;  %v925_v40 = vld [vmem:[#allocation7 + $0x1ec] sm:$0xf]  ;;  %v859_v46 = vor.u32 %v927_v31, %v858_v30  ;;  %v735_v47 = vor.u32 %v893_v32, %v732_v33  ;;  %s594_s3 = sshll.u32 %s1069_s2, 4  ;;  %s595_s3 = int_to_ptr.vmem [resolvable:$true] %s594_s3 }
  0x2c   :  { %512 = vmatpush.bf16.msra.mxu2 %v647_v7  ;;  %v860_v41 = vld [vmem:[#allocation7 + $0x1f8] sm:$0xf0]  ;;  %v79_v42 = vperm.slane %v77_v36, 0  ;;  %v80_v43 = vperm.slane %v77_v36, 1  ;;  %v714_v48 = vld [vmem:[#allocation7 + $0xc8] sm:$0xf] }
  0x2d   :  { %525 = vmatpush.bf16.msra.mxu3 %v775_v11  ;;  %v891_v49 = vld [vmem:[#allocation7 + $0xd4] sm:$0xf0]  ;;  %v842_v50 = vld [vmem:[#allocation7 + $0x1c8] sm:$0xf]  ;;  %v863_v53 = vor.u32 %v925_v40, %v860_v41  ;;  %v889_v55 = vld [vmem:[#allocation7 + $0xcc] sm:$0xf] }
  0x2e   :  { %487 = vmatpush.bf16.msra.mxu0 %v627_v18  ;;  %v83_v51 = vsub.f32 %v75_v35, %v79_v42  ;;  %v84_v52 = vsub.f32 %v76_v37, %v80_v43  ;;  %v923_v54 = vld [vmem:[#allocation7 + $0x1d4] sm:$0xf0]  ;;  %v716_v56 = vld [vmem:[#allocation7 + $0xd8] sm:$0xf0]  ;;  %v921_v57 = vld [vmem:[#allocation7 + $0x1cc] sm:$0xf]  ;;  %v715_v61 = vor.u32 %v891_v49, %v714_v48 }
  0x2f   :  { %500 = vmatpush.bf16.msra.mxu1 %v755_v22  ;;  %v844_v58 = vld [vmem:[#allocation7 + $0x1d8] sm:$0xf0]  ;;  %v843_v62 = vor.u32 %v923_v54, %v842_v50  ;;  %v719_v63 = vor.u32 %v889_v55, %v716_v56  ;;  %v698_v0 = vld [vmem:[#allocation7 + $0xa8] sm:$0xf]  ;;  %v887_v1 = vld [vmem:[#allocation7 + $0xb4] sm:$0xf0] }
  0x30   :  { %513 = vmatpush.bf16.msra.mxu2 %v631_v23  ;;  %v1107_v59 = vpack.c.bf16 %v83_v51, %v83_v51  ;;  %v1109_v60 = vpack.c.bf16 %v84_v52, %v84_v52  ;;  %v826_v2 = vld [vmem:[#allocation7 + $0x1a8] sm:$0xf]  ;;  %v847_v3 = vor.u32 %v921_v57, %v844_v58  ;;  %v919_v4 = vld [vmem:[#allocation7 + $0x1b4] sm:$0xf0]  ;;  %v885_v5 = vld [vmem:[#allocation7 + $0xac] sm:$0xf]  ;;  %v699_v9 = vor.u32 %v887_v1, %v698_v0 }
  0x31   :  { %526 = vmatpush.bf16.msra.mxu3 %v759_v27  ;;  %v700_v6 = vld [vmem:[#allocation7 + $0xb8] sm:$0xf0]  ;;  %v917_v7 = vld [vmem:[#allocation7 + $0x1ac] sm:$0xf]  ;;  %v827_v10 = vor.u32 %v919_v4, %v826_v2  ;;  %v682_v12 = vld [vmem:[#allocation7 + $0x88] sm:$0xf] }
  0x32   :  { %488 = vmatpush.bf16.msra.mxu0 %v611_v34  ;;  %v828_v8 = vld [vmem:[#allocation7 + $0x1b8] sm:$0xf0]  ;;  %v703_v11 = vor.u32 %v885_v5, %v700_v6  ;;  %v883_v13 = vld [vmem:[#allocation7 + $0x94] sm:$0xf0]  ;;  %v810_v14 = vld [vmem:[#allocation7 + $0x188] sm:$0xf] }
  0x33   :  { %501 = vmatpush.bf16.msra.mxu1 %v739_v38  ;;  %v831_v15 = vor.u32 %v917_v7, %v828_v8  ;;  %v915_v16 = vld [vmem:[#allocation7 + $0x194] sm:$0xf0]  ;;  %v881_v17 = vld [vmem:[#allocation7 + $0x8c] sm:$0xf]  ;;  %v684_v18 = vld [vmem:[#allocation7 + $0x98] sm:$0xf0]  ;;  %v683_v21 = vor.u32 %v883_v13, %v682_v12 }
  0x34   :  { %514 = vmatpush.bf16.msra.mxu2 %v615_v39  ;;  %v913_v19 = vld [vmem:[#allocation7 + $0x18c] sm:$0xf]  ;;  %v812_v20 = vld [vmem:[#allocation7 + $0x198] sm:$0xf0]  ;;  %v811_v22 = vor.u32 %v915_v16, %v810_v14  ;;  %v687_v23 = vor.u32 %v881_v17, %v684_v18  ;;  %v666_v24 = vld [vmem:[#allocation7 + $0x68] sm:$0xf] }
  0x35   :  { %527 = vmatpush.bf16.msra.mxu3 %v743_v44  ;;  %489 = vmatmul.bf16.vlgmr.msra.gmra.mxu0 %v1107_v59  ;;  %v879_v25 = vld [vmem:[#allocation7 + $0x74] sm:$0xf0]  ;;  %v794_v26 = vld [vmem:[#allocation7 + $0x168] sm:$0xf]  ;;  %v815_v27 = vor.u32 %v913_v19, %v812_v20  ;;  %v877_v29 = vld [vmem:[#allocation7 + $0x6c] sm:$0xf] }
  0x36   :  { %533 = vmatpush.bf16.msrb.mxu0 %v731_v45  ;;  %502 = vmatmul.bf16.vlgmr.msra.gmra.mxu1 %v1109_v60  ;;  %v911_v28 = vld [vmem:[#allocation7 + $0x174] sm:$0xf0]  ;;  %v668_v30 = vld [vmem:[#allocation7 + $0x78] sm:$0xf0]  ;;  %v909_v31 = vld [vmem:[#allocation7 + $0x16c] sm:$0xf]  ;;  %v667_v33 = vor.u32 %v879_v25, %v666_v24 }
  0x37   :  { %546 = vmatpush.bf16.msrb.mxu1 %v859_v46  ;;  %515 = vmatmul.bf16.vlgmr.msra.gmra.mxu2 %v1107_v59  ;;  %v796_v32 = vld [vmem:[#allocation7 + $0x178] sm:$0xf0]  ;;  %v795_v34 = vor.u32 %v911_v28, %v794_v26  ;;  %v671_v35 = vor.u32 %v877_v29, %v668_v30  ;;  %v650_v36 = vld [vmem:[#allocation7 + $0x48] sm:$0xf]  ;;  %v875_v37 = vld [vmem:[#allocation7 + $0x54] sm:$0xf0] }
  0x38   :  { %559 = vmatpush.bf16.msrb.mxu2 %v735_v47  ;;  %528 = vmatmul.bf16.vlgmr.msra.gmra.mxu3 %v1109_v60  ;;  %v778_v38 = vld [vmem:[#allocation7 + $0x148] sm:$0xf]  ;;  %v799_v39 = vor.u32 %v909_v31, %v796_v32  ;;  %v907_v40 = vld [vmem:[#allocation7 + $0x154] sm:$0xf0]  ;;  %v873_v41 = vld [vmem:[#allocation7 + $0x4c] sm:$0xf]  ;;  %v651_v45 = vor.u32 %v875_v37, %v650_v36 }
  0x39   :  { %572 = vmatpush.bf16.msrb.mxu3 %v863_v53  ;;  %v652_v42 = vld [vmem:[#allocation7 + $0x58] sm:$0xf0]  ;;  %v905_v43 = vld [vmem:[#allocation7 + $0x14c] sm:$0xf]  ;;  %v779_v46 = vor.u32 %v907_v40, %v778_v38  ;;  %v634_v48 = vld [vmem:[#allocation7 + $0x28] sm:$0xf] }
  0x3a   :  { %534 = vmatpush.bf16.msrb.mxu0 %v715_v61  ;;  %v780_v44 = vld [vmem:[#allocation7 + $0x158] sm:$0xf0]  ;;  %v655_v47 = vor.u32 %v873_v41, %v652_v42  ;;  %v871_v49 = vld [vmem:[#allocation7 + $0x34] sm:$0xf0]  ;;  %v762_v50 = vld [vmem:[#allocation7 + $0x128] sm:$0xf] }
  0x3b   :  { %547 = vmatpush.bf16.msrb.mxu1 %v843_v62  ;;  %v783_v51 = vor.u32 %v905_v43, %v780_v44  ;;  %v903_v52 = vld [vmem:[#allocation7 + $0x134] sm:$0xf0]  ;;  %v869_v53 = vld [vmem:[#allocation7 + $0x2c] sm:$0xf]  ;;  %v636_v54 = vld [vmem:[#allocation7 + $0x38] sm:$0xf0]  ;;  %v635_v57 = vor.u32 %v871_v49, %v634_v48 }
  0x3c   :  { %560 = vmatpush.bf16.msrb.mxu2 %v719_v63  ;;  %v901_v55 = vld [vmem:[#allocation7 + $0x12c] sm:$0xf]  ;;  %v764_v56 = vld [vmem:[#allocation7 + $0x138] sm:$0xf0]  ;;  %v763_v58 = vor.u32 %v903_v52, %v762_v50  ;;  %v639_v61 = vor.u32 %v869_v53, %v636_v54  ;;  %v618_v62 = vld [vmem:[#allocation7 + $0x8] sm:$0xf] }
  0x3d   :  { %573 = vmatpush.bf16.msrb.mxu3 %v847_v3  ;;  %v867_v63 = vld [vmem:[#allocation7 + $0x14] sm:$0xf0]  ;;  %v746_v0 = vld [vmem:[#allocation7 + $0x108] sm:$0xf]  ;;  %v767_v1 = vor.u32 %v901_v55, %v764_v56  ;;  %v865_v3 = vld [vmem:[#allocation7 + $0xc] sm:$0xf] }
  0x3e   :  { %535 = vmatpush.bf16.msrb.mxu0 %v699_v9  ;;  %v899_v2 = vld [vmem:[#allocation7 + $0x114] sm:$0xf0]  ;;  %v620_v4 = vld [vmem:[#allocation7 + $0x18] sm:$0xf0]  ;;  %v897_v5 = vld [vmem:[#allocation7 + $0x10c] sm:$0xf]  ;;  %v619_v7 = vor.u32 %v867_v63, %v618_v62 }
  0x3f   :  { %548 = vmatpush.bf16.msrb.mxu1 %v827_v10  ;;  %v748_v6 = vld [vmem:[#allocation7 + $0x118] sm:$0xf0]  ;;  %v747_v8 = vor.u32 %v899_v2, %v746_v0  ;;  %v623_v9 = vor.u32 %v865_v3, %v620_v4  ;;  %s596_s11 = sshll.u32 %s1126_s4, 4  ;;  %s597_s11 = int_to_ptr.hbm [resolvable:$true] %s596_s11 }
  0x40   :  { %561 = vmatpush.bf16.msrb.mxu2 %v703_v11  ;;  %v751_v10 = vor.u32 %v897_v5, %v748_v6  ;;  %v151_v11 = vld [vmem:[#allocation8] sm:$0xf] }
  0x41   :  { %574 = vmatpush.bf16.msrb.mxu3 %v831_v15  ;;  %v153_v12 = vperm.slane %v151_v11, 0  ;;  %v154_v16 = vperm.slane %v151_v11, 1  ;;  %v156_v29 = vperm.slane %v151_v11, 3 }
  0x42   :  { %536 = vmatpush.bf16.msrb.mxu0 %v683_v21 }
  0x43   :  { %549 = vmatpush.bf16.msrb.mxu1 %v811_v22 }
  0x44   :  { %562 = vmatpush.bf16.msrb.mxu2 %v687_v23 }
  0x45   :  { %575 = vmatpush.bf16.msrb.mxu3 %v815_v27 }
  0x46   :  { %537 = vmatpush.bf16.msrb.mxu0 %v667_v33 }
  0x47   :  { %550 = vmatpush.bf16.msrb.mxu1 %v795_v34 }
  0x48   :  { %563 = vmatpush.bf16.msrb.mxu2 %v671_v35 }
  0x49   :  { %576 = vmatpush.bf16.msrb.mxu3 %v799_v39 }
  0x4a   :  { %538 = vmatpush.bf16.msrb.mxu0 %v651_v45 }
  0x4b   :  { %551 = vmatpush.bf16.msrb.mxu1 %v779_v46 }
  0x4c   :  { %564 = vmatpush.bf16.msrb.mxu2 %v655_v47 }
  0x4d   :  { %577 = vmatpush.bf16.msrb.mxu3 %v783_v51 }
  0x4e   :  { %539 = vmatpush.bf16.msrb.mxu0 %v635_v57 }
  0x4f   :  { %552 = vmatpush.bf16.msrb.mxu1 %v763_v58 }
  0x50   :  { %565 = vmatpush.bf16.msrb.mxu2 %v639_v61 }
  0x51   :  { %578 = vmatpush.bf16.msrb.mxu3 %v767_v1 }
  0x52   :  { %540 = vmatpush.bf16.msrb.mxu0 %v619_v7 }
  0x53   :  { %553 = vmatpush.bf16.msrb.mxu1 %v747_v8 }
  0x54   :  { %566 = vmatpush.bf16.msrb.mxu2 %v623_v9 }
  0x55   :  { %579 = vmatpush.bf16.msrb.mxu3 %v751_v10  ;;  %541 = vmatmul.bf16.vlgmr.msrb.gmra.mxu0 %v1107_v59 }
  0x56   :  { %554 = vmatmul.bf16.vlgmr.msrb.gmra.mxu1 %v1109_v60 }
  0x57   :  { %567 = vmatmul.bf16.vlgmr.msrb.gmra.mxu2 %v1107_v59  ;;  %v155_v59 = vperm.slane %v151_v11, 2 }
  0x58   :  { %580 = vmatmul.bf16.vlgmr.msrb.gmra.mxu3 %v1109_v60 }
  0xb2   :  { %v490_v13 = vpop.f32.mrf.mxu0 }
  0xb3   :  { %v491_v14 = vadd.f32 %v490_v13, %v153_v12  ;;  %v503_v15 = vpop.f32.mrf.mxu1 }
  0xb5   :  { %v504_v17 = vadd.f32 %v503_v15, %v491_v14 }
  0xb7   :  { %585 = vst [vmem:[#allocation10] sm:$0xff] %v504_v17 }
  0xba   :  { %v516_v18 = vpop.f32.mrf.mxu2  ;;  %v492_v22 = vpop.f32.mrf.mxu0 }
  0xbb   :  { %v517_v19 = vadd.f32 %v516_v18, %v154_v16  ;;  %v529_v20 = vpop.f32.mrf.mxu3  ;;  %v505_v23 = vpop.f32.mrf.mxu1 }
  0xbd   :  { %v530_v21 = vadd.f32 %v529_v20, %v517_v19 }
  0xbf   :  { %586 = vst [vmem:[#allocation10 + $0x8] sm:$0xff] %v530_v21 }
  0xc2   :  { %v518_v24 = vpop.f32.mrf.mxu2 }
  0xc3   :  { %v531_v25 = vpop.f32.mrf.mxu3 }
  0xd2   :  { %v542_v26 = vpop.f32.mrf.mxu0 }
  0xd3   :  { %v543_v60 = vadd.f32 %v542_v26, %v155_v59  ;;  %v555_v27 = vpop.f32.mrf.mxu1 }
  0xd5   :  { %v556_v28 = vadd.f32 %v555_v27, %v543_v60 }
  0xd7   :  { %587 = vst [vmem:[#allocation10 + $0x10] sm:$0xff] %v556_v28 }
  0xda   :  { %v568_v30 = vpop.f32.mrf.mxu2  ;;  %v544_v33 = vpop.f32.mrf.mxu0 }
  0xdb   :  { %v569_v31 = vadd.f32 %v568_v30, %v156_v29  ;;  %v581_v32 = vpop.f32.mrf.mxu3  ;;  %v557_v34 = vpop.f32.mrf.mxu1 }
  0xdd   :  { %v582_v35 = vadd.f32 %v581_v32, %v569_v31 }
  0xdf   :  { %588 = vst [vmem:[#allocation10 + $0x18] sm:$0xff] %v582_v35 }
  0xe0   :  { %599 = dma.vmem_to_hbm [thread:$0]  %s595_s3, 512, %s597_s11, [#allocation4]  }
  0xe2   :  { %v570_v36 = vpop.f32.mrf.mxu2 }
  0xe3   :  { %v583_v37 = vpop.f32.mrf.mxu3 }
  0xe4   :  { %1061 = dma.done.wait [#allocation4], 512  }
  0xe5   :  { %1062 = vsyncadd [#allocation4], 4294966784 }
  0xe6   :  { %604 = vsyncpa [#allocation3], 1 }
  0xe7   :  { %605 = vsyncpa [#allocation6], 1 }
  0xe8   :  { %606 = vsyncpa [#allocation9], 1 }
  0xe9   :  { %607 = vsyncpa [#allocation4], 1 }

</bundles_post_ra>
